<compile_context>
chip_gen: v5e
topology: v5e:2x2
jax: 0.10.0
libtpu: 0.0.40
codegen_flags: <defaults>
</compile_context>

<pallas_src>
import math

import jax
import jax.numpy as jnp
from jax import lax
from jax.experimental import pallas as pl
from jax.experimental.pallas import tpu as pltpu


def _gdn_kernel_factory(inverse, mm_dtype, newton_refine):
    def gdn_kernel(x_ref, gamma_ref, beta_ref, o_ref):
        # x_ref / o_ref: (C, T) tile; gamma_ref: (C, C) resident; beta_ref: (C, 1).
        x_in = x_ref[...]                                   # native dtype
        xf = x_in.astype(jnp.float32)
        x2 = (xf * xf).astype(mm_dtype)
        # 1x1 conv over channels == channel-mixing matmul on the MXU:
        #   norm[c_out, p] = sum_{c_in} gamma[c_out, c_in] * x2[c_in, p] + beta[c_out]
        norm = jnp.dot(gamma_ref[...], x2,
                       preferred_element_type=jnp.float32) + beta_ref[...]
        if inverse:
            scale = jnp.sqrt(norm)
        else:
            scale = lax.rsqrt(norm)
            if newton_refine:
                # One Newton step -> matches sqrt+divide to ~1 ulp (f32 I/O only).
                scale = scale * (1.5 - 0.5 * norm * scale * scale)
        if o_ref.dtype == jnp.float32:
            o_ref[...] = (xf * scale).astype(o_ref.dtype)
        else:
            # bf16 I/O: final multiply + cast in the narrow dtype keeps the
            # epilogue off the f32 VALU critical slot (v7x at bf16 rates).
            o_ref[...] = x_in * scale.astype(o_ref.dtype)

    return gdn_kernel


def _vmem_limit_bytes():
    """Per-generation scoped-VMEM budget for the pipelined buffers.

    v5e/v6e: 128 MiB physical (but only 16/32 MiB scoped by default);
    v7x: 64 MiB physical.  Keep ~25% headroom for Mosaic internal scratch.
    """
    try:
        cap = int(pltpu.get_tpu_info().vmem_capacity_bytes)
    except Exception:
        cap = 64 * 1024 * 1024                  # conservative (v7x-sized) fallback
    return int(min((cap * 3) // 4, 96 * 1024 * 1024))


def _choose_spatial_tile(hw, c, in_itemsize, out_itemsize, vmem_limit, single_batch):
    """Lane-dense spatial tile length: multiple of 128, or the full extent."""
    # Per spatial column the pipeline holds: 2 double-buffered x tiles,
    # 2 double-buffered out tiles, plus ~4 live f32 intermediates in-kernel.
    bytes_per_col = c * (2 * in_itemsize + 2 * out_itemsize + 4 * 4)
    t_budget = ((vmem_limit * 3) // 4) // max(bytes_per_col, 1)
    # Keep the single x tile itself in the ~2-8 MiB sweet spot: large enough
    # to reach 85%+ of HBM roofline, small enough to leave pipelining headroom.
    t_cap = (8 * 1024 * 1024) // max(c * in_itemsize, 1)
    t_max = max(128, min(t_budget, t_cap))
    if hw <= t_max:
        if single_batch and hw > 128:
            # Guarantee >= 2 grid steps along a 'parallel' axis so both v7x
            # TensorCores get work (negligible extra cost on 1-TC chips).
            half = -(-hw // 2)
            t = -(-half // 128) * 128
            return min(hw, t)
        return hw                               # single block over full spatial extent
    return (t_max // 128) * 128                 # Pallas masks the partial tail block


def gdn_forward(x, beta_raw, gamma_raw, *, inverse=False,
                beta_min=1e-6, reparam_offset=2 ** (-18), matmul_in_bf16=None):
    """GDN forward. x: (B, C, H, W) or (B, C, D, H, W). Returns same shape/dtype.

    matmul_in_bf16: None -> bf16 MXU operands iff x is bf16; set True explicitly
    for f32 inputs on v5e at large C (MXU is bf16-native there); precision of the
    channel mix then drops to ~bf16.
    """
    pedestal = reparam_offset ** 2
    beta_bound = (beta_min + pedestal) ** 0.5
    gamma_bound = reparam_offset

    orig_shape = x.shape
    B, C = orig_shape[0], orig_shape[1]
    HW = int(math.prod(orig_shape[2:]))
    x3d = x.reshape(B, C, HW)                   # free reshape; channels stay contiguous

    if matmul_in_bf16 is None:
        matmul_in_bf16 = (x.dtype == jnp.bfloat16)
    mm_dtype = jnp.bfloat16 if matmul_in_bf16 else jnp.float32

    # Hoisted parameter reparameterization (LowerBound + square - pedestal):
    # a one-time wrapper op instead of per-tile VPU work in the grid loop.
    beta = (jnp.maximum(beta_raw.astype(jnp.float32), beta_bound) ** 2
            - pedestal).reshape(C, 1)
    gamma = (jnp.maximum(gamma_raw.astype(jnp.float32), gamma_bound) ** 2
             - pedestal).astype(mm_dtype)       # (C_out, C_in), cast once in wrapper

    in_itemsize = jnp.dtype(x.dtype).itemsize
    out_itemsize = in_itemsize
    vmem_limit = _vmem_limit_bytes()
    t_hw = _choose_spatial_tile(HW, C, in_itemsize, out_itemsize, vmem_limit,
                                single_batch=(B == 1))
    grid = (B, pl.cdiv(HW, t_hw))               # no host pad; tail block is masked

    cost = pl.CostEstimate(
        flops=2 * C * C * HW * B + 4 * B * C * HW,
        transcendentals=B * C * HW,
        bytes_accessed=B * C * HW * (in_itemsize + out_itemsize)
                       + C * C * jnp.dtype(mm_dtype).itemsize + C * 4,
    )

    out3d = pl.pallas_call(
        _gdn_kernel_factory(inverse, mm_dtype,
                            newton_refine=(x.dtype == jnp.float32)),
        out_shape=jax.ShapeDtypeStruct((B, C, HW), x.dtype),
        grid_spec=pltpu.PrefetchScalarGridSpec(
            num_scalar_prefetch=0,
            grid=grid,
            in_specs=[
                # x tile. Add pipeline_mode=pl.Buffered(3) here only if profiling
                # shows exposed DMA on the strided C-row fetch.
                pl.BlockSpec((None, C, t_hw), lambda b, s: (b, 0, s)),
                pl.BlockSpec((C, C), lambda b, s: (0, 0)),   # gamma (resident)
                pl.BlockSpec((C, 1), lambda b, s: (0, 0)),   # beta  (resident)
            ],
            out_specs=pl.BlockSpec((None, C, t_hw), lambda b, s: (b, 0, s)),
        ),
        compiler_params=pltpu.CompilerParams(
            dimension_semantics=("parallel", "parallel"),
            vmem_limit_bytes=vmem_limit),
        cost_estimate=cost,
    )(x3d, gamma, beta)

    return out3d.reshape(orig_shape)


def init_gdn_params(ch, gamma_init=0.1, reparam_offset=2 ** (-18)):
    """Deterministic init matching GDN.build()."""
    pedestal = reparam_offset ** 2
    beta = jnp.sqrt(jnp.ones((ch,), jnp.float32) + pedestal)
    g = gamma_init * jnp.eye(ch, dtype=jnp.float32) + pedestal
    gamma = jnp.sqrt(g)
    return beta, gamma


def gdn_reference(x, beta_raw, gamma_raw, *, inverse=False,
                  beta_min=1e-6, reparam_offset=2 ** (-18)):
    """Pure-JAX reference mirroring the PyTorch forward (for self-check)."""
    pedestal = reparam_offset ** 2
    beta_bound = (beta_min + pedestal) ** 0.5
    gamma_bound = reparam_offset
    beta = jnp.maximum(beta_raw, beta_bound) ** 2 - pedestal
    gamma = jnp.maximum(gamma_raw, gamma_bound) ** 2 - pedestal
    norm = jnp.einsum('oc,bchw->bohw', gamma, x * x) + beta[None, :, None, None]
    norm = jnp.sqrt(norm)
    return x * norm if inverse else x / norm


if __name__ == "__main__":
    key = jax.random.PRNGKey(0)
    k1, k2, k3, k4, k5 = jax.random.split(key, 5)

    # --- Test 1: default (GDN.build) params, forward + inverse, f32 ---
    B, C, H, W = 2, 4, 16, 16
    x = jax.random.normal(k1, (B, C, H, W), dtype=jnp.float32)
    beta_raw, gamma_raw = init_gdn_params(C)

    out = jax.block_until_ready(gdn_forward(x, beta_raw, gamma_raw, inverse=False))
    ref = gdn_reference(x, beta_raw, gamma_raw, inverse=False)
    assert out.shape == (B, C, H, W)
    assert jnp.allclose(out, ref, atol=1e-5, rtol=1e-5), "forward mismatch vs reference"

    out_inv = jax.block_until_ready(gdn_forward(x, beta_raw, gamma_raw, inverse=True))
    ref_inv = gdn_reference(x, beta_raw, gamma_raw, inverse=True)
    assert jnp.allclose(out_inv, ref_inv, atol=1e-5, rtol=1e-5), "inverse mismatch vs reference"

    # --- Test 2: random NON-symmetric gamma (covers c_out/c_in orientation),
    #     single-batch split path and masked spatial tail block, f32 ---
    B2, C2, H2, W2 = 1, 8, 18, 18
    x2 = jax.random.normal(k2, (B2, C2, H2, W2), dtype=jnp.float32)
    gamma_raw2 = 0.05 + 0.3 * jnp.abs(jax.random.normal(k3, (C2, C2), dtype=jnp.float32))
    beta_raw2 = 1.0 + 0.1 * jnp.abs(jax.random.normal(k4, (C2,), dtype=jnp.float32))
    out2 = jax.block_until_ready(gdn_forward(x2, beta_raw2, gamma_raw2))
    ref2 = gdn_reference(x2, beta_raw2, gamma_raw2)
    assert jnp.allclose(out2, ref2, atol=1e-5, rtol=1e-5), "non-symmetric gamma mismatch"

    # --- Test 3: bf16 I/O path (bf16 MXU operands + bf16 epilogue) ---
    B3, C3, H3, W3 = 1, 8, 32, 32
    x3 = jax.random.normal(k5, (B3, C3, H3, W3), dtype=jnp.float32)
    x3_bf16 = x3.astype(jnp.bfloat16)
    out3 = jax.block_until_ready(gdn_forward(x3_bf16, beta_raw2, gamma_raw2))
    ref3 = gdn_reference(x3_bf16.astype(jnp.float32), beta_raw2, gamma_raw2)
    assert jnp.allclose(out3.astype(jnp.float32), ref3, atol=4e-2, rtol=4e-2), "bf16 mismatch"

    print("KERNEL_OK")
</pallas_src>

<mosaic_0001>
module attributes {stable_mosaic.version = 11 : i64} {
  func.func @gdn_kernel(%arg0: i32, %arg1: i32, %arg2: memref<1x4x256xf32, #tpu.memory_space<vmem>>, %arg3: memref<4x4xf32, #tpu.memory_space<vmem>>, %arg4: memref<4x1xf32, #tpu.memory_space<vmem>>, %arg5: memref<1x4x256xf32, #tpu.memory_space<vmem>>) attributes {dimension_semantics = [#tpu.dimension_semantics<parallel>, #tpu.dimension_semantics<parallel>], iteration_bounds = array<i64: 2, 1>, scalar_prefetch = 0 : i64, scratch_operands = 0 : i64, tpu.core_type = #tpu.core_type<tc>, window_params = [{transform_indices = @transform_0, window_bounds = array<i64: 1, 4, 256>}, {pipeline_mode = #tpu.pipeline_mode<synchronous>, transform_indices = @transform_1, window_bounds = array<i64: 4, 4>}, {pipeline_mode = #tpu.pipeline_mode<synchronous>, transform_indices = @transform_2, window_bounds = array<i64: 4, 1>}, {transform_indices = @transform_3, window_bounds = array<i64: 1, 4, 256>}]} {
    %c0 = arith.constant 0 : index
    %c0_0 = arith.constant 0 : index
    %c0_1 = arith.constant 0 : index
    %0 = vector.load %arg2[%c0, %c0_0, %c0_1] : memref<1x4x256xf32, #tpu.memory_space<vmem>>, vector<1x4x256xf32>
    %1 = vector.shape_cast %0 : vector<1x4x256xf32> to vector<4x256xf32>
    %2 = arith.mulf %1, %1 : vector<4x256xf32>
    %c0_2 = arith.constant 0 : index
    %c0_3 = arith.constant 0 : index
    %3 = vector.load %arg3[%c0_2, %c0_3] : memref<4x4xf32, #tpu.memory_space<vmem>>, vector<4x4xf32>
    %cst = arith.constant dense<0.000000e+00> : vector<4x256xf32>
    %4 = tpu.matmul %3, %2, %cst {dimension_numbers = #tpu.dot_dimension_numbers<[1], [0], [0], [1], [0, 0, 1, 1], [], []>} : vector<4x4xf32>, vector<4x256xf32>, vector<4x256xf32> -> vector<4x256xf32>
    %c0_4 = arith.constant 0 : index
    %c0_5 = arith.constant 0 : index
    %5 = vector.load %arg4[%c0_4, %c0_5] : memref<4x1xf32, #tpu.memory_space<vmem>>, vector<4x1xf32>
    %6 = vector.broadcast %5 : vector<4x1xf32> to vector<4x256xf32>
    %7 = arith.addf %4, %6 : vector<4x256xf32>
    %8 = math.rsqrt %7 : vector<4x256xf32>
    %cst_6 = arith.constant 5.000000e-01 : f32
    %9 = vector.broadcast %cst_6 : f32 to vector<4x256xf32>
    %10 = arith.mulf %9, %7 : vector<4x256xf32>
    %11 = arith.mulf %10, %8 : vector<4x256xf32>
    %12 = arith.mulf %11, %8 : vector<4x256xf32>
    %cst_7 = arith.constant 1.500000e+00 : f32
    %13 = vector.broadcast %cst_7 : f32 to vector<4x256xf32>
    %14 = arith.subf %13, %12 : vector<4x256xf32>
    %15 = arith.mulf %8, %14 : vector<4x256xf32>
    %16 = arith.mulf %1, %15 : vector<4x256xf32>
    %c0_8 = arith.constant 0 : index
    %c0_9 = arith.constant 0 : index
    %c0_10 = arith.constant 0 : index
    %17 = vector.load %arg5[%c0_8, %c0_9, %c0_10] : memref<1x4x256xf32, #tpu.memory_space<vmem>>, vector<1x4x256xf32>
    %18 = vector.shape_cast %17 : vector<1x4x256xf32> to vector<4x256xf32>
    %19 = vector.shape_cast %16 : vector<4x256xf32> to vector<1x4x256xf32>
    tpu.vector_store %arg5[%c0_8, %c0_9, %c0_10], %19 {strides = array<i32>} : memref<1x4x256xf32, #tpu.memory_space<vmem>>, vector<1x4x256xf32>,
    return
  }
  func.func @transform_0(%arg0: i32, %arg1: i32) -> (i32, i32, i32) {
    %c0_i32 = arith.constant 0 : i32
    %c0_i32_0 = arith.constant 0 : i32
    return %arg0, %c0_i32, %arg1 : i32, i32, i32
  }
  func.func @transform_1(%arg0: i32, %arg1: i32) -> (i32, i32) {
    %c0_i32 = arith.constant 0 : i32
    %c0_i32_0 = arith.constant 0 : i32
    %c0_i32_1 = arith.constant 0 : i32
    return %c0_i32, %c0_i32_0 : i32, i32
  }
  func.func @transform_2(%arg0: i32, %arg1: i32) -> (i32, i32) {
    %c0_i32 = arith.constant 0 : i32
    %c0_i32_0 = arith.constant 0 : i32
    %c0_i32_1 = arith.constant 0 : i32
    return %c0_i32, %c0_i32_0 : i32, i32
  }
  func.func @transform_3(%arg0: i32, %arg1: i32) -> (i32, i32, i32) {
    %c0_i32 = arith.constant 0 : i32
    %c0_i32_0 = arith.constant 0 : i32
    return %arg0, %c0_i32, %arg1 : i32, i32, i32
  }
}

</mosaic_0001>

<bundles_post_ra>
// kernel: tpu_custom_call.1
= control target key start
LH: loop header
LB: loop body
LE: loop exit
PB: predicated region body
PF: predicated region fallthrough
CT: control target
= control target key end

     0   :  { %8 = vsyncpa [#allocation3], 0  ;;  %s768_s0 = inlined_call_operand.hbm [shape: f32[2,4,256], index: 0, kind: input, shape index: {}]   ;;  %s769_s1 = inlined_call_operand.vmem [shape: f32[4,4], index: 1, kind: input, shape index: {}]   ;;  %s770_s2 = inlined_call_operand.vmem [shape: f32[4,1], index: 2, kind: input, shape index: {}]   ;;  %s771_s3 = inlined_call_operand.hbm [shape: f32[2,4,256], index: 3, kind: output, shape index: {}]  }
   0x1   :  { %10 = vsyncpa [#allocation3 + $0x1], 0 }
   0x2   :  { %11 = vsyncpa [#allocation4], 0 }
   0x3   :  { %13 = vsyncpa [#allocation4 + $0x1], 0  ;;  %s635_s12 = smov 0   ;;  %s637_s13 = smov 0  }
   0x4   :  { %s639_s14 = smov 0   ;;  %s641_s15 = smov 0  }
   0x5   :  { %s643_s16 = smov 0   ;;  %s645_s17 = smov 0  }
   0x6 LB: > { %s411_s18 = sadd.s32 4294967295, %s612_s17   ;;  %s412_s19 = sadd.s32 4294967294, %s612_s17   ;;  %s612_s17 = sphi %s645_s17, %s19_s17   ;;  %s608_s16 = sphi %s643_s16, %s780_s16   ;;  %s604_s15 = sphi %s641_s15, %s779_s15   ;;  %s600_s14 = sphi %s639_s14, %s778_s14   ;;  %s596_s13 = sphi %s637_s13, %s777_s13   ;;  %s592_s12 = sphi %s635_s12, %s776_s12  }
   0x7   : > { %s31_s20 = sadd.s32 1, %s608_s16  ;;  %s40_s21 = sadd.s32 1, %s600_s14 }
   0x8   : > { %p33_p0 = scmp.ge.s32.totalorder %s31_s20, 2  ;;  %p47_p1 = scmp.ne.s32.totalorder %s600_s14, %s596_s13 }
   0x9   : > { %p48_p2 = scmp.eq.s32.totalorder %s612_s17, 0  ;;  %p53_p3 = scmp.ne.s32.totalorder %s596_s13, %s592_s12 }
   0xa   : > { %s782_s20 = smov (%p33_p0, %s31_s20), 0  ;;  %p54_p5 = scmp.eq.s32.totalorder %s411_s18, 0 }
   0xb   : > { %p676_p4 = por %p48_p2, %p47_p1  ;;  %s35_s23 = ssub.s32 %s608_s16, %s782_s20 }
   0xc   : > { %p121_p6 = scmp.eq.s32.totalorder %s411_s18, 1  ;;  %p38_p7 = scmp.eq.s32.totalorder %s35_s23, 0 }
   0xd   : > { %p682_p8 = por %p54_p5, %p53_p3  ;;  %p127_p10 = scmp.eq.s32.totalorder %s412_s19, 1 }
   0xe   : > { %p686_p9 = por %p121_p6, %p47_p1  ;;  %p414_p12 = scmp.ge.s32.totalorder %s612_s17, 2 }
   0xf   : > { %s691_s26 = scalar_select %p38_p7, %s600_s14, %s40_s21  }
  0x10   : > { %p693_p11 = por %p127_p10, %p53_p3  ;;  %p444_p13 = scmp.lt.s32.totalorder %s612_s17, 2 }
  0x11   : > { %s153_s28 = sand.u32 1, %s600_s14   ;;  %s430_s30 = sshll.u32 %s608_s16, 3 }
  0x12   : > { %s415_s29 = sshll.u32 %s153_s28, 3  ;;  %s164_s6 = scalar_lea.hbm %s768_s0, %s430_s30 }
  0x13   : > { %s157_s7 = scalar_lea.vmem [#allocation2], %s415_s29  ;;  %s166_s9 = sshll.u32 %s164_s6, 4  ;;  %s167_s9 = int_to_ptr.hbm [resolvable:$true] %s166_s9 }
  0x14   : > { %s168_s8 = sshll.u32 %s157_s7, 4  ;;  %p437_p0 = pnand %p444_p13, %p676_p4  ;;  %s169_s8 = int_to_ptr.vmem [resolvable:$true] %s168_s8 }
  0x15   : > { %p418_p1 = scmp.ge.s32.totalorder %s612_s17, 1  ;;  %p173_p2 = scmp.lt.s32.totalorder %s612_s17, 3 }
  0x16   : > { %s154_s10 = scalar_lea.sflag [#allocation3], %s153_s28 }
  0x17   : > { %439 = dma.hbm_to_vmem [thread:$0]  (!%p437_p0), %s167_s9, 128, %s169_s8, %s154_s10  }
  0x18   : > { %p174_p3 = pnand %p418_p1, %p173_p2 }
  0x19   : > { %s709_s11 = sand.u32 (!%p174_p3), 1, %s596_s13  }
  0x1a   : > { %177 = sbr.rel (%p174_p3) target bundleno = 207 (0xcf), region = 32  ;;  %s419_s18 = sshll.u32 (!%p174_p3), %s709_s11, 3 }
  0x1b   : > { %s180_s19 = scalar_lea.sflag (!%p174_p3), [#allocation3], %s709_s11  ;;  %s183_s21 = scalar_lea.vmem (!%p174_p3), [#allocation2], %s419_s18 }
  0x1f   : > { %583 = dma.done.wait (%p682_p8), %s180_s19, 128  }
  0x20   : > { %585 = vsyncadd (%p682_p8), %s180_s19, 4294967168  ;;  %v614_v0 = vmov 0   ;;  %v209_v1 = vld [vmem:[%s183_s21] sm:$0xff]  ;;  %v212_v2 = vld [vmem:[%s770_s2] sm:$0xf]  ;;  %vm226_vm0 = vcmask 1043456  }
  0x21   : > { %495 = vset.pattern.permute.xlu0 %v614_v0  ;;  %v210_v3 = vmul.f32 %v209_v1, %v209_v1  ;;  %v211_v4 = vld [vmem:[%s769_s1] sm:$0xf]  ;;  %vm222_vm1 = vcmask 31744   ;;  %s431_s24 = sshll.u32 %s604_s15, 3  ;;  %s206_s6 = scalar_lea.vmem [#allocation5], %s419_s18 }
  0x22   : > { %215 = vperm.xlu0 %495, %v212_v2   ;;  %s322_s5 = scalar_lea.hbm %s771_s3, %s431_s24  ;;  %s324_s7 = sshll.u32 %s206_s6, 4  ;;  %s325_s7 = int_to_ptr.vmem [resolvable:$true] %s324_s7 }
  0x23   : > { %219 = vst [vmem:[#allocation1] ss:$2 sm:$0xff] %v210_v3  ;;  %s326_s8 = sshll.u32 %s322_s5, 4  ;;  %s309_s15 = scalar_lea.sflag [#allocation4], %s709_s11  ;;  %s327_s8 = int_to_ptr.hbm [resolvable:$true] %s326_s8 }
  0x24   : > { %s544_s9 = sshra.s32 %s327_s8, 4  ;;  %s550_s18 = scalar_lea.hbm %s771_s3, 16  ;;  %s545_s9 = int_to_ptr.hbm [resolvable:$true] %s544_s9 }
  0x25   : > { %s546_s10 = scalar_lea.hbm %s545_s9, 8  ;;  %p551_p7 = scmp.lt.s32.totalorder %s545_s9, %s771_s3 }
  0x26   : > { %p547_p4 = scmp.ne.s32.totalorder %s545_s9, %s546_s10  ;;  %p552_p8 = scmp.lt.s32.totalorder %s550_s18, %s546_s10 }
  0x28   : > { %p548_p5 = pnand %p547_p4, %p686_p9  ;;  %p553_p10 = por %p552_p8, %p551_p7 }
  0x2a   : > { %v220_v5 = vld.sshfl [vmem:[#allocation1] sm:$0xff pattern:$0x75316420]  ;;  %v221_v6 = vld.sshfl [vmem:[#allocation1 + $0x8] sm:$0xff pattern:$0x75316420]  ;;  %p549_p6 = pneg %p548_p5 }
  0x2b   : > { %421 = vmatpush.msk.msra.mxu0 %vm226_vm0, %v220_v5  ;;  %423 = vmatpush.msk.msra.mxu1 %vm226_vm0, %v221_v6 }
  0x2c   : > { %422 = vmatmul.msk.f32.vlgmr.msra.gmra.mxu0 %vm222_vm1, %v211_v4  ;;  %424 = vmatmul.msk.f32.vlgmr.msra.gmra.mxu1 %vm222_vm1, %v211_v4  ;;  %p554_p13 = pnand %p553_p10, %p549_p6 }
  0x94   : > { %v216_v7 = vpop.permute.xlu0 %215 }
  0xa9   : > { %v248_v8 = vpop.f32.mrf.mxu0  ;;  %v268_v9 = vpop.f32.mrf.mxu1 }
  0xaa   : > { %v249_v10 = vadd.f32 %v248_v8, %v216_v7  ;;  %v269_v11 = vadd.f32 %v268_v9, %v216_v7 }
  0xac   : > { %496 = vrsqrt.f32 %v249_v10  ;;  %vm277_vm4 = vweird.f32 %v249_v10  ;;  %v291_v23 = vmul.f32 0.5, %v249_v10  ;;  %vm287_vm6 = vweird.f32 %v269_v11 }
  0xad   : > { %498 = vrsqrt.f32 %v269_v11  ;;  %v292_v26 = vmul.f32 0.5, %v269_v11 }
  0xb2   : > { %v497_v12 = vpop.eup %496 }
  0xb3   : > { %v499_v13 = vpop.eup %498  ;;  %v272_v14 = vmul.f32 %v497_v12, %v249_v10  ;;  %vm278_vm2 = vweird.f32 %v497_v12 }
  0xb4   : > { %v282_v15 = vmul.f32 %v499_v13, %v269_v11  ;;  %vm288_vm3 = vweird.f32 %v499_v13  ;;  %vm279_vm5 = vmor %vm277_vm4, %vm278_vm2 }
  0xb5   : > { %v273_v16 = vmul.f32 %v497_v12, %v272_v14  ;;  %vm289_vm7 = vmor %vm287_vm6, %vm288_vm3 }
  0xb6   : > { %v283_v17 = vmul.f32 %v499_v13, %v282_v15 }
  0xb7   : > { %v274_v18 = vmul.f32 0.5, %v273_v16 }
  0xb8   : > { %v284_v19 = vmul.f32 0.5, %v283_v17 }
  0xb9   : > { %v275_v20 = vsub.f32 1.5, %v274_v18 }
  0xba   : > { %v285_v21 = vsub.f32 1.5, %v284_v19 }
  0xbb   : > { %v276_v22 = vmul.f32 %v497_v12, %v275_v20 }
  0xbc   : > { %v286_v24 = vmul.f32 %v499_v13, %v285_v21 }
  0xbd   : > { %v280_v25 = vsel %vm279_vm5, %v497_v12, %v276_v22 }
  0xbe   : > { %v293_v27 = vmul.f32 %v291_v23, %v280_v25  ;;  %v290_v28 = vsel %vm289_vm7, %v499_v13, %v286_v24 }
  0xbf   : > { %v294_v29 = vmul.f32 %v292_v26, %v290_v28 }
  0xc0   : > { %v295_v30 = vmul.f32 %v293_v27, %v280_v25 }
  0xc1   : > { %v296_v31 = vmul.f32 %v294_v29, %v290_v28 }
  0xc2   : > { %v297_v32 = vsub.f32 1.5, %v295_v30 }
  0xc3   : > { %v298_v33 = vsub.f32 1.5, %v296_v31 }
  0xc4   : > { %v299_v35 = vmul.f32 %v297_v32, %v280_v25 }
  0xc5   : > { %v300_v34 = vmul.f32 %v298_v33, %v290_v28 }
  0xc7   : > { %v303_v36 = vrot.slane %v300_v34, 4 }
  0xc9   : > { %v304_v37 = vsel %vm226_vm0, %v299_v35, %v303_v36 }
  0xca   : > { %v306_v38 = vmul.f32 %v304_v37, %v209_v1 }
  0xcc   : > { %307 = vst [vmem:[%s206_s6] sm:$0xff] %v306_v38 }
  0xcd   : > { %557 = shalt.err (!%p554_p13)
}
  0xce   : > { %434 = dma.vmem_to_hbm [thread:$0]  (%p686_p9), %s325_s7, 128, %s327_s8, %s309_s15  }
  0xcf PF: > { %s338_s11 = sand.u32 1, %s592_s12   ;;  %p441_p0 = pnand %p414_p12, %p693_p11 }
  0xd0   : > { %s339_s28 = scalar_lea.sflag [#allocation4], %s338_s11 }
  0xd1   : > { %p442_p1 = pneg %p441_p0 }
  0xd3   : > { %587 = dma.done.wait (%p442_p1), %s339_s28, 128  }
  0xd4   : > { %589 = vsyncadd (%p442_p1), %s339_s28, 4294967168  ;;  %s19_s17 = sadd.s32 1, %s612_s17   ;;  %s776_s12 = smov %s596_s13 }
  0xd5   : > { %p16_p2 = scmp.ge.s32.totalorder %s19_s17, 4   ;;  %s777_s13 = smov %s600_s14 }
  0xd6   : > { %s778_s14 = smov %s691_s26  ;;  %s779_s15 = smov %s608_s16 }
  0xd7   : > { %s780_s16 = smov %s782_s20  ;;  %18 = sbr.rel (!%p16_p2) target bundleno = 6 (0x6), region = 77 }
  0xdc   :  { %345 = vsyncpa [#allocation3], 1 }
  0xdd   :  { %347 = vsyncpa [#allocation3 + $0x1], 1 }
  0xde   :  { %348 = vsyncpa [#allocation4], 1 }
  0xdf   :  { %350 = vsyncpa [#allocation4 + $0x1], 1 }

</bundles_post_ra>
